<compile_context>
chip_gen: v6e
topology: v6e:2x2x1
jax: 0.10.0
libtpu: 0.0.40
codegen_flags: <defaults>
</compile_context>

<pallas_src>
import functools

import jax
import jax.numpy as jnp
from jax.experimental import pallas as pl
from jax.experimental.pallas import tpu as pltpu


def _round_up(n: int, m: int) -> int:
    return ((n + m - 1) // m) * m


# ---------------------------------------------------------------------------
# Pallas kernel: one (token_tile, layer) grid step of the stacked feed-forward.
# ---------------------------------------------------------------------------
def _ff_stack_kernel(*refs, train: bool, dropout_p: float, negative_slope: float):
    if train:
        x_ref, w1_ref, b1_ref, w2_ref, b2_ref, u_ref, o_ref, h_ref = refs
    else:
        x_ref, w1_ref, b1_ref, w2_ref, b2_ref, o_ref, h_ref = refs

    layer = pl.program_id(1)

    # First layer of this token tile: load the input into the resident carry.
    @pl.when(layer == 0)
    def _():
        h_ref[...] = x_ref[...].astype(jnp.float32)

    h = h_ref[...]                                             # (tn, emb) f32

    # linear_1 + leaky_relu
    a = jnp.dot(h, w1_ref[0].astype(jnp.float32),
                preferred_element_type=jnp.float32)
    a = a + b1_ref[0].astype(jnp.float32)                      # (tn, ff)
    a = jnp.where(a >= 0.0, a, negative_slope * a)

    # dropout (training only): mask supplied from outside, inverted scaling.
    if train:
        keep = u_ref[0] >= dropout_p
        a = jnp.where(keep, a * (1.0 / (1.0 - dropout_p)), 0.0)

    # linear_2
    y = jnp.dot(a, w2_ref[0].astype(jnp.float32),
                preferred_element_type=jnp.float32)
    y = y + b2_ref[0].astype(jnp.float32)                      # (tn, emb)

    h_ref[...] = y                                             # carry to next layer
    o_ref[...] = y.astype(o_ref.dtype)                         # final writeback picks last layer


# ---------------------------------------------------------------------------
# Wrapper: repeatFeedForward forward pass.
# ---------------------------------------------------------------------------
def repeat_feed_forward(x, params, *, dropout_p: float = 0.2, train: bool = False,
                        rng_key=None, negative_slope: float = 0.01,
                        tile_n: int = 512):
    """Apply `repeats` FeedForward layers with a single Pallas TPU kernel.

    x:      (..., emb) input.
    params: (w1, b1, w2, b2) stacked per layer:
            w1 (R, emb, ff), b1 (R, 1, ff), w2 (R, ff, emb), b2 (R, 1, emb).
    """
    w1, b1, w2, b2 = params
    repeats, emb, ff = w1.shape
    assert x.shape[-1] == emb

    orig_shape = x.shape
    x2 = x.reshape(-1, emb)
    n = x2.shape[0]

    # Token tiling: multiples of 8 sublanes, ~512 rows per tile by default.
    tn = min(tile_n, _round_up(n, 8))
    n_pad = _round_up(n, tn)
    if n_pad != n:
        x2 = jnp.pad(x2, ((0, n_pad - n), (0, 0)))
    num_tiles = n_pad // tn
    grid = (num_tiles, repeats)                  # layers innermost -> carry resident

    in_specs = [
        pl.BlockSpec((tn, emb), lambda t, l: (t, 0)),        # x (resident across layers)
        pl.BlockSpec((1, emb, ff), lambda t, l: (l, 0, 0)),  # W1[l]
        pl.BlockSpec((1, 1, ff), lambda t, l: (l, 0, 0)),    # b1[l]
        pl.BlockSpec((1, ff, emb), lambda t, l: (l, 0, 0)),  # W2[l]
        pl.BlockSpec((1, 1, emb), lambda t, l: (l, 0, 0)),   # b2[l]
    ]
    inputs = [x2, w1, b1, w2, b2]

    use_dropout = bool(train) and dropout_p > 0.0
    if use_dropout:
        if rng_key is None:
            rng_key = jax.random.PRNGKey(0)
        # Fresh uniforms per (layer, token, ff); caller must thread a fresh key per step.
        u = jax.random.uniform(rng_key, (repeats, n_pad, ff), dtype=jnp.float32)
        in_specs.append(pl.BlockSpec((1, tn, ff), lambda t, l: (l, t, 0)))
        inputs.append(u)

    kernel = functools.partial(
        _ff_stack_kernel,
        train=use_dropout,
        dropout_p=float(dropout_p),
        negative_slope=float(negative_slope),
    )

    out = pl.pallas_call(
        kernel,
        out_shape=jax.ShapeDtypeStruct((n_pad, emb), x.dtype),
        grid=grid,
        in_specs=in_specs,
        out_specs=pl.BlockSpec((tn, emb), lambda t, l: (t, 0)),
        scratch_shapes=[pltpu.VMEM((tn, emb), jnp.float32)],  # resident activation carry
        compiler_params=pltpu.CompilerParams(
            dimension_semantics=("parallel", "arbitrary"),
        ),
    )(*inputs)

    return out[:n].reshape(orig_shape)


# ---------------------------------------------------------------------------
# Parameter construction + pure-JAX reference (eval mode).
# ---------------------------------------------------------------------------
def init_params(key, repeats: int, emb: int, ff: int):
    k1, k2, k3, k4 = jax.random.split(key, 4)
    lim1 = 1.0 / (emb ** 0.5)
    lim2 = 1.0 / (ff ** 0.5)
    w1 = jax.random.uniform(k1, (repeats, emb, ff), jnp.float32, -lim1, lim1)
    b1 = jax.random.uniform(k2, (repeats, 1, ff), jnp.float32, -lim1, lim1)
    w2 = jax.random.uniform(k3, (repeats, ff, emb), jnp.float32, -lim2, lim2)
    b2 = jax.random.uniform(k4, (repeats, 1, emb), jnp.float32, -lim2, lim2)
    return w1, b1, w2, b2


def ref_forward(x, params, negative_slope: float = 0.01):
    """Pure-JAX reference of repeatFeedForward in eval mode (dropout = identity)."""
    w1, b1, w2, b2 = params
    h = x
    for i in range(w1.shape[0]):
        a = jnp.dot(h, w1[i]) + b1[i]
        a = jnp.where(a >= 0.0, a, negative_slope * a)
        h = jnp.dot(a, w2[i]) + b2[i]
    return h


if __name__ == "__main__":
    # Shapes consistent with the module: emb_dim=4, ff_dim=5, a few repeats,
    # batch=2, seq=8.
    REPEATS, EMB, FF = 3, 4, 5
    B, S = 2, 8

    key = jax.random.PRNGKey(0)
    k_x, k_p, k_d = jax.random.split(key, 3)

    x = jax.random.normal(k_x, (B, S, EMB), dtype=jnp.float32)
    params = init_params(k_p, REPEATS, EMB, FF)

    # Eval-mode forward (dropout identity) — deterministic, checkable.
    out = repeat_feed_forward(x, params, dropout_p=0.2, train=False)
    out = jax.block_until_ready(out)

    ref = ref_forward(x, params)
    assert out.shape == (B, S, EMB)
    assert jnp.allclose(out, ref, atol=1e-5, rtol=1e-5), "mismatch vs reference"

    # Training-mode forward (inverted dropout with host-generated mask) — just run it.
    out_train = repeat_feed_forward(x, params, dropout_p=0.2, train=True, rng_key=k_d)
    jax.block_until_ready(out_train)
    assert out_train.shape == (B, S, EMB)

    print("KERNEL_OK")
</pallas_src>

<mosaic_0001>
module attributes {stable_mosaic.version = 11 : i64} {
  func.func @_ff_stack_kernel(%arg0: i32, %arg1: i32, %arg2: memref<16x4xf32, #tpu.memory_space<vmem>>, %arg3: memref<1x4x5xf32, #tpu.memory_space<vmem>>, %arg4: memref<1x1x5xf32, #tpu.memory_space<vmem>>, %arg5: memref<1x5x4xf32, #tpu.memory_space<vmem>>, %arg6: memref<1x1x4xf32, #tpu.memory_space<vmem>>, %arg7: memref<16x4xf32, #tpu.memory_space<vmem>>, %arg8: memref<16x4xf32, #tpu.memory_space<vmem>>) attributes {dimension_semantics = [#tpu.dimension_semantics<parallel>, #tpu.dimension_semantics<arbitrary>], iteration_bounds = array<i64: 1, 3>, scalar_prefetch = 0 : i64, scratch_operands = 1 : i64, tpu.core_type = #tpu.core_type<tc>, window_params = [{transform_indices = @transform_0, window_bounds = array<i64: 16, 4>}, {transform_indices = @transform_1, window_bounds = array<i64: 1, 4, 5>}, {transform_indices = @transform_2, window_bounds = array<i64: 1, 1, 5>}, {transform_indices = @transform_3, window_bounds = array<i64: 1, 5, 4>}, {transform_indices = @transform_4, window_bounds = array<i64: 1, 1, 4>}, {transform_indices = @transform_5, window_bounds = array<i64: 16, 4>}]} {
    %c0_i32 = arith.constant 0 : i32
    %0 = arith.cmpi eq, %arg1, %c0_i32 : i32
    %1 = arith.extui %0 : i1 to i32
    %c0_i32_0 = arith.constant 0 : i32
    %2 = arith.cmpi ne, %1, %c0_i32_0 : i32
    scf.if %2 {
      %c0_21 = arith.constant 0 : index
      %c0_22 = arith.constant 0 : index
      %25 = vector.load %arg2[%c0_21, %c0_22] : memref<16x4xf32, #tpu.memory_space<vmem>>, vector<16x4xf32>
      %c0_23 = arith.constant 0 : index
      %c0_24 = arith.constant 0 : index
      %26 = vector.load %arg8[%c0_23, %c0_24] : memref<16x4xf32, #tpu.memory_space<vmem>>, vector<16x4xf32>
      tpu.vector_store %arg8[%c0_23, %c0_24], %25 {strides = array<i32>} : memref<16x4xf32, #tpu.memory_space<vmem>>, vector<16x4xf32>,
    } else {
    }
    %c0 = arith.constant 0 : index
    %c0_1 = arith.constant 0 : index
    %3 = vector.load %arg8[%c0, %c0_1] : memref<16x4xf32, #tpu.memory_space<vmem>>, vector<16x4xf32>
    %c0_2 = arith.constant 0 : index
    %c0_3 = arith.constant 0 : index
    %c0_4 = arith.constant 0 : index
    %4 = vector.load %arg3[%c0_2, %c0_3, %c0_4] : memref<1x4x5xf32, #tpu.memory_space<vmem>>, vector<1x4x5xf32>
    %5 = vector.shape_cast %4 : vector<1x4x5xf32> to vector<4x5xf32>
    %cst = arith.constant dense<0.000000e+00> : vector<16x5xf32>
    %6 = tpu.matmul %3, %5, %cst {dimension_numbers = #tpu.dot_dimension_numbers<[1], [0], [0], [1], [0, 0, 1, 1], [], []>} : vector<16x4xf32>, vector<4x5xf32>, vector<16x5xf32> -> vector<16x5xf32>
    %c0_5 = arith.constant 0 : index
    %c0_6 = arith.constant 0 : index
    %c0_7 = arith.constant 0 : index
    %7 = vector.load %arg4[%c0_5, %c0_6, %c0_7] : memref<1x1x5xf32, #tpu.memory_space<vmem>>, vector<1x1x5xf32>
    %8 = vector.shape_cast %7 : vector<1x1x5xf32> to vector<1x5xf32>
    %9 = vector.broadcast %8 : vector<1x5xf32> to vector<16x5xf32>
    %10 = arith.addf %6, %9 : vector<16x5xf32>
    %cst_8 = arith.constant 0.000000e+00 : f32
    %11 = vector.broadcast %cst_8 : f32 to vector<16x5xf32>
    %12 = arith.cmpf oge, %10, %11 : vector<16x5xf32>
    %cst_9 = arith.constant 0.00999999977 : f32
    %13 = vector.broadcast %cst_9 : f32 to vector<16x5xf32>
    %14 = arith.mulf %13, %10 : vector<16x5xf32>
    %15 = arith.select %12, %10, %14 : vector<16x5xi1>, vector<16x5xf32>
    %c0_10 = arith.constant 0 : index
    %c0_11 = arith.constant 0 : index
    %c0_12 = arith.constant 0 : index
    %16 = vector.load %arg5[%c0_10, %c0_11, %c0_12] : memref<1x5x4xf32, #tpu.memory_space<vmem>>, vector<1x5x4xf32>
    %17 = vector.shape_cast %16 : vector<1x5x4xf32> to vector<5x4xf32>
    %cst_13 = arith.constant dense<0.000000e+00> : vector<16x4xf32>
    %18 = tpu.matmul %15, %17, %cst_13 {dimension_numbers = #tpu.dot_dimension_numbers<[1], [0], [0], [1], [0, 0, 1, 1], [], []>} : vector<16x5xf32>, vector<5x4xf32>, vector<16x4xf32> -> vector<16x4xf32>
    %c0_14 = arith.constant 0 : index
    %c0_15 = arith.constant 0 : index
    %c0_16 = arith.constant 0 : index
    %19 = vector.load %arg6[%c0_14, %c0_15, %c0_16] : memref<1x1x4xf32, #tpu.memory_space<vmem>>, vector<1x1x4xf32>
    %20 = vector.shape_cast %19 : vector<1x1x4xf32> to vector<1x4xf32>
    %21 = vector.broadcast %20 : vector<1x4xf32> to vector<16x4xf32>
    %22 = arith.addf %18, %21 : vector<16x4xf32>
    %c0_17 = arith.constant 0 : index
    %c0_18 = arith.constant 0 : index
    %23 = vector.load %arg8[%c0_17, %c0_18] : memref<16x4xf32, #tpu.memory_space<vmem>>, vector<16x4xf32>
    tpu.vector_store %arg8[%c0_17, %c0_18], %22 {strides = array<i32>} : memref<16x4xf32, #tpu.memory_space<vmem>>, vector<16x4xf32>,
    %c0_19 = arith.constant 0 : index
    %c0_20 = arith.constant 0 : index
    %24 = vector.load %arg7[%c0_19, %c0_20] : memref<16x4xf32, #tpu.memory_space<vmem>>, vector<16x4xf32>
    tpu.vector_store %arg7[%c0_19, %c0_20], %22 {strides = array<i32>} : memref<16x4xf32, #tpu.memory_space<vmem>>, vector<16x4xf32>,
    return
  }
  func.func @transform_0(%arg0: i32, %arg1: i32) -> (i32, i32) {
    %c0_i32 = arith.constant 0 : i32
    %c0_i32_0 = arith.constant 0 : i32
    return %arg0, %c0_i32 : i32, i32
  }
  func.func @transform_1(%arg0: i32, %arg1: i32) -> (i32, i32, i32) {
    %c0_i32 = arith.constant 0 : i32
    %c0_i32_0 = arith.constant 0 : i32
    %c0_i32_1 = arith.constant 0 : i32
    return %arg1, %c0_i32, %c0_i32_0 : i32, i32, i32
  }
  func.func @transform_2(%arg0: i32, %arg1: i32) -> (i32, i32, i32) {
    %c0_i32 = arith.constant 0 : i32
    %c0_i32_0 = arith.constant 0 : i32
    %c0_i32_1 = arith.constant 0 : i32
    return %arg1, %c0_i32, %c0_i32_0 : i32, i32, i32
  }
  func.func @transform_3(%arg0: i32, %arg1: i32) -> (i32, i32, i32) {
    %c0_i32 = arith.constant 0 : i32
    %c0_i32_0 = arith.constant 0 : i32
    %c0_i32_1 = arith.constant 0 : i32
    return %arg1, %c0_i32, %c0_i32_0 : i32, i32, i32
  }
  func.func @transform_4(%arg0: i32, %arg1: i32) -> (i32, i32, i32) {
    %c0_i32 = arith.constant 0 : i32
    %c0_i32_0 = arith.constant 0 : i32
    %c0_i32_1 = arith.constant 0 : i32
    return %arg1, %c0_i32, %c0_i32_0 : i32, i32, i32
  }
  func.func @transform_5(%arg0: i32, %arg1: i32) -> (i32, i32) {
    %c0_i32 = arith.constant 0 : i32
    %c0_i32_0 = arith.constant 0 : i32
    return %arg0, %c0_i32 : i32, i32
  }
}

</mosaic_0001>

<bundles_post_ra>
// kernel: tpu_custom_call.1
= control target key start
LH: loop header
LB: loop body
LE: loop exit
PB: predicated region body
PF: predicated region fallthrough
CT: control target
= control target key end

     0   :  { %s732_s18 = smov 0   ;;  %s734_s19 = smov 0   ;;  %s800_s0 = inlined_call_operand.vmem [shape: f32[16,4], index: 0, kind: input, shape index: {}]   ;;  %s801_s1 = inlined_call_operand.vmem [shape: f32[3,4,5], index: 1, kind: input, shape index: {}]   ;;  %s802_s2 = inlined_call_operand.vmem [shape: f32[3,1,5], index: 2, kind: input, shape index: {}]   ;;  %s803_s3 = inlined_call_operand.vmem [shape: f32[3,5,4], index: 3, kind: input, shape index: {}]   ;;  %s804_s4 = inlined_call_operand.vmem [shape: f32[3,1,4], index: 4, kind: input, shape index: {}]   ;;  %s805_s5 = inlined_call_operand.vmem [shape: f32[16,4], index: 5, kind: output, shape index: {}]  }
   0x1   :  { %s736_s20 = smov 0  }
   0x2 LB: > { %s24_s21 = sadd.s32 1, %s696_s19  ;;  %p622_p0 = scmp.ge.s32.totalorder %s700_s20, 1  ;;  %s700_s20 = sphi %s736_s20, %s15_s20   ;;  %s696_s19 = sphi %s734_s19, %s807_s19   ;;  %s692_s18 = sphi %s732_s18, %s806_s18  }
   0x3   : > { %p25_p1 = scmp.ge.s32.totalorder %s24_s21, 3  ;;  %p234_p2 = scmp.lt.s32.totalorder %s700_s20, 4 }
   0x5   : > { %s809_s21 = smov (%p25_p1, %s24_s21), 0  ;;  %p235_p3 = pnand %p622_p0, %p234_p2 }
   0x6   : > { %p282_p4 = scmp.lt.s32.totalorder (!%p235_p3), %s692_s18, 2  ;;  %p625_p5 = scmp.ne.s32.totalorder (!%p235_p3), %s692_s18, 0 }
   0x7   : > { %238 = sbr.rel (%p235_p3) target bundleno = 427 (0x1ab), region = 40 }
   0xc   : > { %s750_s22 = scalar_select %p282_p4, %s692_s18, 2 }
   0xd   : > { %305 = sbr.rel (%p625_p5) target bundleno = 20 (0x14), region = 44 }
   0xe   : > { %s623_s23 = sshll.u32 %s750_s22, 2  ;;  %s288_s26 = scalar_lea.vmem %s802_s2, %s750_s22 }
   0xf   : > { %s285_s29 = scalar_lea.vmem %s801_s1, %s623_s23  ;;  %s624_s30 = sshll.u32 %s750_s22, 3 }
  0x10   : > { %s292_s8 = scalar_lea.vmem %s803_s3, %s624_s30  ;;  %s295_s11 = scalar_lea.vmem %s804_s4, %s750_s22 }
  0x12   : > { %v306_v0 = vld [vmem:[%s800_s0] sm:$0xff]  ;;  %vm308_vm0 = vcmask 31744   ;;  %v307_v1 = vld [vmem:[%s800_s0 + $0x8] sm:$0xff] }
  0x13   : > { %309 = vst.msk [vmem:[#allocation2] sm:$0xff] %vm308_vm0, %v306_v0  ;;  %310 = vst.msk [vmem:[#allocation2 + $0x8] sm:$0xff] %vm308_vm0, %v307_v1 }
  0x14 PF: > { %v313_v2 = vld [vmem:[%s285_s29] sm:$0xf]  ;;  %vm328_vm1 = vcmask 1043456   ;;  %vm321_vm2 = vcmask 31744   ;;  %vm428_vm3 = vcmask 1044480   ;;  %vm421_vm6 = vcmask 39936  }
  0x15   : > { %644 = vmatprep.subr.msk.mxu0 %vm328_vm1, %v313_v2  ;;  %v413_v5 = vld [vmem:[%s292_s8] sm:$0x1f] }
  0x16   : > { %645 = vmatpush3.msk.msra.mxu0 %vm328_vm1, %v313_v2  ;;  %649 = vmatprep.subr.msk.mxu1 %vm428_vm3, %v413_v5  ;;  %v626_v6 = vld [vmem:[%s288_s26] ss:$0 sm:$0xff] }
  0x17   : > { %650 = vmatpush3.msk.msra.mxu1 %vm428_vm3, %v413_v5  ;;  %v630_v15 = vld [vmem:[%s295_s11] ss:$0 sm:$0xff] }
  0x1a   : > { %v311_v3 = vld [vmem:[#allocation2] sm:$0xff]  ;;  %v312_v4 = vld [vmem:[#allocation2 + $0x8] sm:$0xff] }
  0x1b   : > { %646 = vmatprep.mubr.msk.f32.mxu0 %vm321_vm2, %v311_v3 }
  0x1c   : > { %647 = vmatmul.mubr.msk.f32.vlgmr.msra.gmra.mxu0 %vm321_vm2, %v312_v4 }
  0xdc   : > { %v648_v7 = vpop.f32.mrf.mxu0 }
  0xdd   : > { %v404_v8 = vadd.f32 %v648_v7, %v626_v6 }
  0xde   : > { %v398_v9 = vpop.f32.mrf.mxu0 }
  0xdf   : > { %v399_v10 = vadd.f32 %v626_v6, %v398_v9  ;;  %v410_v11 = vmul.f32 0.01, %v404_v8  ;;  %vm408_vm4 = vcmp.ge.f32.partialorder %v404_v8, 0.0 }
  0xe1   : > { %vm407_vm5 = vcmp.ge.f32.partialorder %v399_v10, 0.0  ;;  %v409_v12 = vmul.f32 0.01, %v399_v10  ;;  %v412_v14 = vsel %vm408_vm4, %v404_v8, %v410_v11 }
  0xe3   : > { %v411_v13 = vsel %vm407_vm5, %v399_v10, %v409_v12 }
  0xe4   : > { %651 = vmatprep.mubr.msk.f32.mxu1 %vm421_vm6, %v411_v13 }
  0xe5   : > { %652 = vmatmul.mubr.msk.f32.vlgmr.msra.gmra.mxu1 %vm421_vm6, %v412_v14 }
 0x1a5   : > { %v653_v16 = vpop.f32.mrf.mxu1 }
 0x1a6   : > { %v504_v17 = vadd.f32 %v653_v16, %v630_v15 }
 0x1a7   : > { %v498_v18 = vpop.f32.mrf.mxu1 }
 0x1a8   : > { %508 = vst.msk [vmem:[#allocation2 + $0x8] sm:$0xff] %vm321_vm2, %v504_v17  ;;  %510 = vst.msk [vmem:[%s805_s5 + $0x8] sm:$0xff] %vm321_vm2, %v504_v17  ;;  %v499_v19 = vadd.f32 %v630_v15, %v498_v18 }
 0x1aa   : > { %507 = vst.msk [vmem:[#allocation2] sm:$0xff] %vm321_vm2, %v499_v19  ;;  %509 = vst.msk [vmem:[%s805_s5] sm:$0xff] %vm321_vm2, %v499_v19 }
 0x1ab PF: > { %s15_s20 = sadd.s32 1, %s700_s20   ;;  %s806_s18 = smov %s696_s19 }
 0x1ac   : > { %p12_p6 = scmp.ge.s32.totalorder %s15_s20, 5   ;;  %s807_s19 = smov %s809_s21 }
 0x1ae   :  { %14 = sbr.rel (!%p12_p6) target bundleno = 2 (0x2), region = 86 }

</bundles_post_ra>
